<compile_context>
chip_gen: v6e
topology: v6e:2x2x1
jax: 0.10.0
libtpu: 0.0.40
codegen_flags: <defaults>
</compile_context>

<pallas_src>
import jax
import jax.numpy as jnp
from jax.experimental import pallas as pl
from jax.experimental.pallas import tpu as pltpu


_LANES = 128
_SUBLANES = 8

# Per-grid-step DMA budget summed over the *large* streams (x read + out
# write, plus the full-size `a` read on the fallback path).  8 MiB total
# => ~4 MiB blocks on the common 2-stream path.
_TARGET_TOTAL_BLOCK_BYTES = 8 << 20
# Never shrink a block below this just to get more grid steps.
_MIN_BLOCK_BYTES = 512 << 10
# Aim for at least this many grid steps so the DMA pipeline overlaps and both
# v7x TensorCores get work.
_MIN_GRID_STEPS = 8
# Explicit scoped-VMEM budget: > v5e's 16 MiB default, < v7x's 64 MiB physical.
_VMEM_LIMIT_BYTES = 48 << 20


def _prod(xs):
    out = 1
    for v in xs:
        out *= int(v)
    return out


def _sublane_quantum(itemsize):
    # Packed-tile sublane count: 8 for 4-byte, 16 for 2-byte, 32 for 1-byte.
    return _SUBLANES * max(1, 4 // int(itemsize))


def _choose_block(rows, cols, itemsize, n_big_streams):
    """Pick an (sub_q,128)-legal block of ~constant BYTES, capped for grid occupancy."""
    sub_q = _sublane_quantum(itemsize)
    per_stream_bytes = max(_MIN_BLOCK_BYTES,
                           _TARGET_TOTAL_BLOCK_BYTES // max(1, n_big_streams))
    target = per_stream_bytes // itemsize            # elements per block
    total = rows * cols
    # Keep >= _MIN_GRID_STEPS grid steps for medium tensors, floor at 512 KiB.
    cap = max(_MIN_BLOCK_BYTES // itemsize, pl.cdiv(total, _MIN_GRID_STEPS))
    target = max(min(target, cap), sub_q * _LANES)

    if cols * min(rows, sub_q) <= target or cols <= _LANES:
        bc = cols                                    # full dim: always legal
    else:
        bc = (min(cols, max(_LANES, target // min(rows, sub_q))) // _LANES) * _LANES

    br = max(1, target // bc)
    if br >= rows:
        br = rows                                    # full dim: always legal
    else:
        br = max(sub_q, (br // sub_q) * sub_q)       # packed-sublane multiple
        br = min(br, rows)
    return br, bc


def _make_bent_ident_kernel(b: float):
    two_b = 2.0 * float(b)
    four_b_sq = 4.0 * float(b) * float(b)

    def kernel(x_ref, a_ref, o_ref):
        # Compute in f32 regardless of I/O dtype (v5e has no bf16 VPU; matches
        # PyTorch fp32 numerics for bf16 inputs).
        x = x_ref[...].astype(jnp.float32)
        a = a_ref[...].astype(jnp.float32)
        # Blend coefficients on the (tiny, on the row/lane paths) `a` tile.
        c_x = 0.5 + 0.5 * a        # (1 + a) / 2
        c_bent = 0.5 - 0.5 * a     # (1 - a) / 2
        bent = jnp.sqrt(x * x + four_b_sq) - two_b   # sqrt -> EUP (free slot)
        o_ref[...] = (c_x * x + c_bent * bent).astype(o_ref.dtype)

    return kernel


def bent_ident_par(x, a, b: float = 1.0):
    """BentIdent parametric activation via Pallas.

    x: any-shape float array (e.g. NCHW activations).
    a: array broadcastable against x (e.g. (1, C, 1, 1) per-channel slope).
    b: Python float (the module's fixed `b` hyperparameter).
    """
    x = jnp.asarray(x)
    a = jnp.asarray(a)
    final_shape = jnp.broadcast_shapes(x.shape, a.shape)   # PyTorch broadcasting
    out_dtype = x.dtype

    if any(int(d) == 0 for d in final_shape):
        return jnp.zeros(final_shape, out_dtype)

    if x.shape != final_shape:
        x = jnp.broadcast_to(x, final_shape)
    if len(final_shape) == 0:                               # scalar case
        x = x.reshape(1, 1)
        a = a.reshape(1, 1)

    shape = tuple(int(d) for d in x.shape)
    ndim = len(shape)
    itemsize = int(jnp.dtype(out_dtype).itemsize)
    sub_q = _sublane_quantum(itemsize)

    # Right-align a's shape against x (numpy/PyTorch broadcasting rules).
    a_shape = (1,) * (ndim - a.ndim) + tuple(int(d) for d in a.shape)

    # Smallest `split` such that `a` has size 1 on every axis >= split.
    split = ndim
    while split > 0 and a_shape[split - 1] == 1:
        split -= 1

    def _util(rows, cols):
        lane = cols / (pl.cdiv(cols, _LANES) * _LANES)
        sub = min(rows, sub_q) / sub_q
        return lane * sub

    # Candidates: (score = vreg_util / hbm_streams, kind, rows, cols, split).
    candidates = []
    if split < ndim:
        # `a` constant over trailing axes -> tiny (rows, 1) stream.  Fold extra
        # trailing unit-`a` axes into the row group for sublane density while
        # the remaining column group stays lane-dense.
        fsplit = split
        while (fsplit < ndim - 1 and _prod(shape[:fsplit]) < sub_q
               and _prod(shape[fsplit + 1:]) >= _LANES):
            fsplit += 1
        rows, cols = _prod(shape[:fsplit]), _prod(shape[fsplit:])
        candidates.append((_util(rows, cols) / 2.0, "row", rows, cols, fsplit))
    elif all(d == 1 for d in a_shape[:-1]):
        # `a` varies only along the innermost axis (channels-last).
        rows, cols = _prod(shape[:-1]), shape[-1]
        candidates.append((_util(rows, cols) / 2.0, "lane", rows, cols, ndim - 1))

    # Fallback: full broadcast of `a` (kept in x's dtype) over the most
    # vreg-dense axis split.  ~+50% HBM traffic, so it only wins when the
    # tiny-`a` layouts are badly lane/sublane sparse.
    best = None
    for k in range(ndim + 1):
        rows, cols = _prod(shape[:k]), _prod(shape[k:])
        s = _util(rows, cols)
        if best is None or s > best[0] + 1e-9:
            best = (s, rows, cols, k)
    candidates.append((best[0] / 3.0, "full", best[1], best[2], best[3]))

    _, kind, rows, cols, ksplit = max(candidates, key=lambda c: c[0])

    n_big = 3 if kind == "full" else 2
    br, bc = _choose_block(rows, cols, itemsize, n_big)

    x2 = x.reshape(rows, cols)
    block_spec = pl.BlockSpec((br, bc), lambda i, j: (i, j))
    if kind == "row":
        a_lead = a.reshape(a_shape[:ksplit] + (1,) * (ndim - ksplit))
        a2 = jnp.broadcast_to(a_lead, shape[:ksplit] + (1,) * (ndim - ksplit))
        a2 = a2.reshape(rows, 1).astype(jnp.float32)        # tiny: f32 is fine
        a_spec = pl.BlockSpec((br, 1), lambda i, j: (i, 0))
    elif kind == "lane":
        a2 = a.reshape(1, cols).astype(jnp.float32)         # tiny: f32 is fine
        a_spec = pl.BlockSpec((1, bc), lambda i, j: (0, j))
    else:  # "full"
        # Keep in x's dtype (not f32) to minimise the extra HBM read.
        a2 = jnp.broadcast_to(a.reshape(a_shape), shape).reshape(rows, cols)
        a2 = a2.astype(out_dtype)
        a_spec = pl.BlockSpec((br, bc), lambda i, j: (i, j))

    grid = (pl.cdiv(rows, br), pl.cdiv(cols, bc))
    n_elems = rows * cols
    cost = pl.CostEstimate(
        flops=6 * n_elems,
        transcendentals=n_elems,
        bytes_accessed=2 * n_elems * itemsize + a2.size * a2.dtype.itemsize,
    )

    out = pl.pallas_call(
        _make_bent_ident_kernel(b),
        out_shape=jax.ShapeDtypeStruct((rows, cols), out_dtype),
        grid=grid,
        in_specs=[block_spec, a_spec],
        out_specs=block_spec,
        compiler_params=pltpu.CompilerParams(
            # Both axes independent -> shardable across v7x's 2 TensorCores.
            dimension_semantics=("parallel", "parallel"),
            vmem_limit_bytes=_VMEM_LIMIT_BYTES,
        ),
        cost_estimate=cost,
    )(x2, a2)

    return out.reshape(final_shape)


def bent_ident_par_ref(x, a, b: float = 1.0):
    """Pure-JAX reference matching the PyTorch forward exactly."""
    return (1.0 - a) / 2.0 * (jnp.sqrt(x * x + 4.0 * b * b) - 2.0 * b) \
        + (1.0 + a) / 2.0 * x


if __name__ == "__main__":
    key = jax.random.PRNGKey(0)
    kx, ka, kx2, ka2, kx3, ka3 = jax.random.split(key, 6)
    b = 1.0

    # 1) NCHW activations with a per-channel slope (intended use) -> "row" path.
    N, C, H, W = 2, 4, 16, 16
    x = jax.random.normal(kx, (N, C, H, W), dtype=jnp.float32)
    a = jax.random.uniform(ka, (1, C, 1, 1), dtype=jnp.float32)
    out = jax.block_until_ready(bent_ident_par(x, a, b))
    ref = bent_ident_par_ref(x, a, b)
    assert out.shape == ref.shape and out.dtype == x.dtype
    assert jnp.allclose(out, ref, atol=1e-6, rtol=1e-6)

    # 2) Channels-last, lane-aligned channel count (C=128) -> "lane" path.
    x2 = jax.random.normal(kx2, (2, 8, 128), dtype=jnp.float32)
    a2 = jax.random.uniform(ka2, (128,), dtype=jnp.float32)
    out2 = jax.block_until_ready(bent_ident_par(x2, a2, b))
    assert jnp.allclose(out2, bent_ident_par_ref(x2, a2, b), atol=1e-6, rtol=1e-6)

    # 3) Channels-last, small channel count (C=32) -> lane-dense "full" path.
    x3 = jax.random.normal(kx3, (2, 16, 16, 32), dtype=jnp.float32)
    a3 = jax.random.uniform(ka3, (32,), dtype=jnp.float32)
    out3 = jax.block_until_ready(bent_ident_par(x3, a3, b))
    assert jnp.allclose(out3, bent_ident_par_ref(x3, a3, b), atol=1e-6, rtol=1e-6)

    print("KERNEL_OK")
</pallas_src>

<mosaic_0001>
module attributes {stable_mosaic.version = 11 : i64} {
  func.func @kernel(%arg0: i32, %arg1: i32, %arg2: memref<8x256xf32, #tpu.memory_space<vmem>>, %arg3: memref<8x1xf32, #tpu.memory_space<vmem>>, %arg4: memref<8x256xf32, #tpu.memory_space<vmem>>) attributes {dimension_semantics = [#tpu.dimension_semantics<parallel>, #tpu.dimension_semantics<parallel>], iteration_bounds = array<i64: 1, 1>, scalar_prefetch = 0 : i64, scratch_operands = 0 : i64, tpu.core_type = #tpu.core_type<tc>, window_params = [{transform_indices = @transform_0, window_bounds = array<i64: 8, 256>}, {transform_indices = @transform_1, window_bounds = array<i64: 8, 1>}, {transform_indices = @transform_2, window_bounds = array<i64: 8, 256>}]} {
    %c0 = arith.constant 0 : index
    %c0_0 = arith.constant 0 : index
    %0 = vector.load %arg2[%c0, %c0_0] : memref<8x256xf32, #tpu.memory_space<vmem>>, vector<8x256xf32>
    %c0_1 = arith.constant 0 : index
    %c0_2 = arith.constant 0 : index
    %1 = vector.load %arg3[%c0_1, %c0_2] : memref<8x1xf32, #tpu.memory_space<vmem>>, vector<8x1xf32>
    %cst = arith.constant 5.000000e-01 : f32
    %2 = vector.broadcast %cst : f32 to vector<8x1xf32>
    %3 = arith.mulf %2, %1 : vector<8x1xf32>
    %cst_3 = arith.constant 5.000000e-01 : f32
    %4 = vector.broadcast %cst_3 : f32 to vector<8x1xf32>
    %5 = arith.addf %4, %3 : vector<8x1xf32>
    %cst_4 = arith.constant 5.000000e-01 : f32
    %6 = vector.broadcast %cst_4 : f32 to vector<8x1xf32>
    %7 = arith.mulf %6, %1 : vector<8x1xf32>
    %cst_5 = arith.constant 5.000000e-01 : f32
    %8 = vector.broadcast %cst_5 : f32 to vector<8x1xf32>
    %9 = arith.subf %8, %7 : vector<8x1xf32>
    %10 = arith.mulf %0, %0 : vector<8x256xf32>
    %cst_6 = arith.constant 4.000000e+00 : f32
    %11 = vector.broadcast %cst_6 : f32 to vector<8x256xf32>
    %12 = arith.addf %10, %11 : vector<8x256xf32>
    %13 = math.sqrt %12 : vector<8x256xf32>
    %cst_7 = arith.constant 2.000000e+00 : f32
    %14 = vector.broadcast %cst_7 : f32 to vector<8x256xf32>
    %15 = arith.subf %13, %14 : vector<8x256xf32>
    %16 = vector.broadcast %5 : vector<8x1xf32> to vector<8x256xf32>
    %17 = arith.mulf %16, %0 : vector<8x256xf32>
    %18 = vector.broadcast %9 : vector<8x1xf32> to vector<8x256xf32>
    %19 = arith.mulf %18, %15 : vector<8x256xf32>
    %20 = arith.addf %17, %19 : vector<8x256xf32>
    %c0_8 = arith.constant 0 : index
    %c0_9 = arith.constant 0 : index
    %21 = vector.load %arg4[%c0_8, %c0_9] : memref<8x256xf32, #tpu.memory_space<vmem>>, vector<8x256xf32>
    tpu.vector_store %arg4[%c0_8, %c0_9], %20 {strides = array<i32>} : memref<8x256xf32, #tpu.memory_space<vmem>>, vector<8x256xf32>,
    return
  }
  func.func @transform_0(%arg0: i32, %arg1: i32) -> (i32, i32) {
    %c0_i32 = arith.constant 0 : i32
    return %arg0, %arg1 : i32, i32
  }
  func.func @transform_1(%arg0: i32, %arg1: i32) -> (i32, i32) {
    %c0_i32 = arith.constant 0 : i32
    %c0_i32_0 = arith.constant 0 : i32
    return %arg0, %c0_i32 : i32, i32
  }
  func.func @transform_2(%arg0: i32, %arg1: i32) -> (i32, i32) {
    %c0_i32 = arith.constant 0 : i32
    return %arg0, %arg1 : i32, i32
  }
}

</mosaic_0001>

<bundles_post_ra>
// kernel: tpu_custom_call.1
= control target key start
LH: loop header
LB: loop body
LE: loop exit
PB: predicated region body
PF: predicated region fallthrough
CT: control target
= control target key end

     0   :  { %7 = vsyncpa [#allocation3], 0  ;;  %s164_s0 = inlined_call_operand.hbm [shape: f32[8,256], index: 0, kind: input, shape index: {}]   ;;  %s165_s1 = inlined_call_operand.vmem [shape: f32[8,1], index: 1, kind: input, shape index: {}]   ;;  %s166_s2 = inlined_call_operand.hbm [shape: f32[8,256], index: 2, kind: output, shape index: {}]  }
   0x1   :  { %8 = vsyncpa [#allocation4], 0  ;;  %s137_s9 = smov [#allocation2]  }
   0x2   :  { %s15_s10 = sshll.u32 %s137_s9, 4  ;;  %s16_s10 = int_to_ptr.vmem [resolvable:$true] %s15_s10 }
   0x3   :  { %s101_s11 = scalar_lea.vmem %s16_s10, 256  ;;  %p106_p1 = scmp.lt.s32.totalorder %s16_s10, %s16_s10 }
   0x4   :  { %p102_p0 = scmp.ne.s32.totalorder %s16_s10, %s101_s11  ;;  %p107_p2 = scmp.lt.s32.totalorder %s101_s11, %s101_s11 }
   0x6   :  { %p108_p3 = por %p107_p2, %p106_p1 }
   0x8   :  { %p109_p4 = pnand %p108_p3, %p102_p0 }
   0xa   :  { %112 = shalt.err (!%p109_p4)
}
   0xb   :  { %18 = dma.hbm_to_vmem [thread:$0]  %s164_s0, 256, %s16_s10, [#allocation3]  }
   0xc   :  { %133 = dma.done.wait [#allocation3], 256  }
   0xd   :  { %134 = vsyncadd [#allocation3], 4294967040  ;;  %v138_v0 = vmov 0   ;;  %v26_v1 = vld [vmem:[%s165_s1] sm:$0xff]  ;;  %v25_v6 = vld [vmem:[#allocation2 + $0x8] sm:$0xff]  ;;  %s139_s0 = smov [#allocation5]  }
   0xe   :  { %88 = vset.pattern.permute.xlu0 %v138_v0  ;;  %v27_v2 = vmul.f32 0.5, %v26_v1  ;;  %v24_v5 = vld [vmem:[#allocation2] sm:$0xff]  ;;  %v31_v8 = vmul.f32 %v25_v6, %v25_v6  ;;  %s74_s1 = sshll.u32 %s139_s0, 4  ;;  %s75_s1 = int_to_ptr.vmem [resolvable:$true] %s74_s1 }
   0xf   :  { %v30_v7 = vmul.f32 %v24_v5, %v24_v5  ;;  %s113_s16 = scalar_lea.vmem %s75_s1, 256  ;;  %p118_p6 = scmp.lt.s32.totalorder %s75_s1, %s75_s1 }
  0x10   :  { %v28_v3 = vadd.f32 0.5, %v27_v2  ;;  %v29_v4 = vsub.f32 0.5, %v27_v2  ;;  %v33_v10 = vadd.f32 4.0, %v31_v8  ;;  %p114_p5 = scmp.ne.s32.totalorder %s75_s1, %s113_s16  ;;  %p119_p7 = scmp.lt.s32.totalorder %s113_s16, %s113_s16 }
  0x11   :  { %v32_v9 = vadd.f32 4.0, %v30_v7 }
  0x12   :  { %52 = vperm.xlu0 %88, %v28_v3   ;;  %vm43_vm1 = vcmp.eq.f32.partialorder %v33_v10, inf  ;;  %v46_v16 = vand.u32 2147483648, %v33_v10  ;;  %vm45_vm3 = vcmp.eq.f32.partialorder %v33_v10, 0.0  ;;  %p120_p8 = por %p119_p7, %p118_p6 }
  0x13   :  { %89 = vrsqrt.f32 %v32_v9  ;;  %vm36_vm0 = vcmp.eq.f32.partialorder %v32_v9, inf  ;;  %v39_v15 = vand.u32 2147483648, %v32_v9  ;;  %vm38_vm2 = vcmp.eq.f32.partialorder %v32_v9, 0.0 }
  0x14   :  { %91 = vrsqrt.f32 %v33_v10  ;;  %p121_p9 = pnand %p120_p8, %p114_p5 }
  0x16   :  { %59 = vperm.xlu0 %88, %v29_v4  }
  0x20   :  { %v90_v11 = vpop.eup %89 }
  0x21   :  { %v92_v12 = vpop.eup %91  ;;  %v35_v13 = vmul.f32 %v90_v11, %v32_v9 }
  0x22   :  { %v42_v14 = vmul.f32 %v92_v12, %v33_v10 }
  0x23   :  { %v37_v17 = vsel %vm36_vm0, %v32_v9, %v35_v13 }
  0x24   :  { %v44_v18 = vsel %vm43_vm1, %v33_v10, %v42_v14  ;;  %v40_v19 = vsel %vm38_vm2, %v39_v15, %v37_v17 }
  0x25   :  { %v47_v20 = vsel %vm45_vm3, %v46_v16, %v44_v18  ;;  %v83_v22 = vadd.f32 -2.0, %v40_v19 }
  0x26   :  { %v84_v23 = vadd.f32 -2.0, %v47_v20 }
  0x8d   :  { %v53_v21 = vpop.permute.xlu0 %52 }
  0x8e   :  { %v55_v25 = vmul.f32 %v53_v21, %v24_v5  ;;  %v56_v26 = vmul.f32 %v53_v21, %v25_v6 }
  0x91   :  { %v60_v24 = vpop.permute.xlu0 %59 }
  0x92   :  { %v62_v27 = vmul.f32 %v83_v22, %v60_v24  ;;  %v63_v28 = vmul.f32 %v84_v23, %v60_v24 }
  0x94   :  { %v64_v29 = vadd.f32 %v62_v27, %v55_v25  ;;  %v65_v30 = vadd.f32 %v63_v28, %v56_v26 }
  0x96   :  { %66 = vst [vmem:[#allocation5] sm:$0xff] %v64_v29  ;;  %67 = vst [vmem:[#allocation5 + $0x8] sm:$0xff] %v65_v30 }
  0x97   :  { %124 = shalt.err (!%p121_p9)
}
  0x98   :  { %77 = dma.vmem_to_hbm [thread:$0]  %s75_s1, 256, %s166_s2, [#allocation4]  }
  0x99   :  { %135 = dma.done.wait [#allocation4], 256  }
  0x9a   :  { %136 = vsyncadd [#allocation4], 4294967040 }
  0x9b   :  { %81 = vsyncpa [#allocation3], 1 }
  0x9c   :  { %82 = vsyncpa [#allocation4], 1 }

</bundles_post_ra>
